<compile_context>
chip_gen: v7x
topology: tpu7x:2x2x1
jax: 0.10.0
libtpu: 0.0.40
codegen_flags: <defaults>
</compile_context>

<pallas_src>
import numpy as np
import jax
import jax.numpy as jnp
from jax.experimental import pallas as pl
from jax.experimental.pallas import tpu as pltpu


# ----------------------------- configuration (hparams) -----------------------------
class HParams:
    structured_d_in_ls = (6, 10)   # cont = 6 feats, cat = 10 feats -> backbone d_in = 16
    n_blocks = 2
    structured_d_hidden = 32
    notes_d_hidden = 32
    n_class = 4
    prototype_dim = 8
    dropout = 0.1                  # inference: identity
    notes_d_in = 768               # fixed by nn.Linear(768, notes_d_hidden)


OUT_LANES = 128        # packed lane-dense output slab: [probs | slogits | nlogits | unc | 0-pad]
_EPS = 1e-30           # robustness eps on the final DS normalization (numerically negligible)

# kernel parameter order (everything else in the folded dict is reference-only)
_PARAM_ORDER = (
    "w0", "b0", "w1", "b1",
    "w_feat_cls", "b_feat_cls",      # (H, H+C+P)   fused [feats | slogits | proto cross]
    "w_notes", "b_notes",            # (768, Hn+C+P) fused [reduced | nlogits | proto cross]
    "r_expand",                      # (2P, 10P)    0/1 lane-expansion matrix (MXU)
    "dsm_const",                     # (8, 128)     rows: gamma | log(alpha) | (u-1) packed
)


def _round_up(x, m):
    return (x + m - 1) // m * m


# --------------------------------- Pallas kernel ------------------------------------
def _enn_fused_kernel(
    x_ref, notes_ref,
    w0_ref, b0_ref, w1_ref, b1_ref,
    wfc_ref, bfc_ref,
    wnt_ref, bnt_ref,
    r_ref, const_ref,
    out_ref,
):
    f32 = jnp.float32
    P = r_ref.shape[0] // 2            # prototypes per modality (power of 2)
    G = r_ref.shape[1] // P            # groups = 2 * (C + 1)
    C = G // 2 - 1                     # n_class
    H = wfc_ref.shape[1] - C - P       # structured feature width
    Hn = wnt_ref.shape[1] - C - P      # notes reduced width

    def linear(a, w_ref, b_ref):
        return jnp.dot(a, w_ref[...], preferred_element_type=f32) + b_ref[...]

    # ---- structured backbone: 2 x (Linear -> ReLU); dropout = identity at inference ----
    h = jnp.maximum(linear(x_ref[...], w0_ref, b0_ref), 0.0)
    h = jnp.maximum(linear(h, w1_ref, b1_ref), 0.0)
    fused_s = linear(h, wfc_ref, bfc_ref)                 # (TB, H+C+P)
    feats = fused_s[:, :H]
    slogits = fused_s[:, H:H + C]
    cross_s = fused_s[:, H + C:H + C + P]                 # -2*feats@proto^T + ||proto||^2

    # ---- notes branch: ONE 768-deep bf16 MXU pass (f32 accumulation) for all three heads ----
    fused_n = linear(notes_ref[...], wnt_ref, bnt_ref)    # (TB, Hn+C+P), f32
    reduced = fused_n[:, :Hn]
    nlogits = fused_n[:, Hn:Hn + C]
    cross_n = fused_n[:, Hn + C:Hn + C + P]

    # ---- prototype squared distances (matmul identity; -2 p^T and ||p||^2 folded above) ----
    fsq_s = jnp.sum(feats * feats, axis=1, keepdims=True)        # (TB, 1)
    fsq_n = jnp.sum(reduced * reduced, axis=1, keepdims=True)    # (TB, 1)
    d = jnp.concatenate(
        [jnp.maximum(fsq_s + cross_s, 0.0),
         jnp.maximum(fsq_n + cross_n, 0.0)], axis=1)             # (TB, 2P)

    gamma = const_ref[0:1, :2 * P]                               # (1, 2P)
    log_alpha = const_ref[1:2, :2 * P]                           # (1, 2P)
    s_both = jnp.exp(log_alpha - gamma * d)                      # (TB, 2P)  s = alpha*exp(-gamma*d)

    # ---- lane-packed Dempster products (both modalities + omega groups at once) ----
    # expand s to prototype-major packed layout (lane = p*G + g) via a tiny MXU matmul
    s_pack = jnp.dot(s_both, r_ref[...], preferred_element_type=f32)      # (TB, G*P)
    t = s_pack * const_ref[2:3, :G * P] + 1.0                             # s*u + (1-s)
    # product over prototypes = contiguous-slice tree fold (no rolls / strided extraction)
    n = G * P
    while n > G:
        half = n // 2
        t = t[:, :half] * t[:, half:n]
        n = half
    gp = t                                                                 # (TB, G) group products

    # unnormalized per-modality masses (per-modality DS normalizations cancel downstream)
    m_s = gp[:, :C] - gp[:, C:C + 1]                   # structured singleton masses (TB, C)
    om_s = gp[:, C:C + 1]                              # structured omega mass        (TB, 1)
    m_n = gp[:, C + 1:2 * C + 1] - gp[:, 2 * C + 1:2 * C + 2]
    om_n = gp[:, 2 * C + 1:2 * C + 2]

    # ---- Dempster_layer(2, C) + DempsterNormalize + pignistic ----
    M = m_s * (m_n + om_n) + om_s * m_n                # (TB, C)
    M_om = om_s * om_n                                 # (TB, 1)
    inv = pl.reciprocal(jnp.sum(M, axis=1, keepdims=True) + M_om + _EPS, approx=True)
    probs = (M + M_om * (1.0 / C)) * inv
    unc = M_om * inv

    # ---- one lane-dense (TB, 128) store: [probs | slogits | nlogits | unc | 0-pad] ----
    pad = jnp.zeros((out_ref.shape[0], out_ref.shape[1] - (3 * C + 1)), f32)
    out_ref[...] = jnp.concatenate([probs, slogits, nlogits, unc, pad], axis=1)


# --------------------------------- wrapper -------------------------------------------
def mlp_enn_one_structured_forward(folded, cont, cat, notes):
    """Fused forward. `folded` are the init-time folded parameters (see fold_params)."""
    x = jnp.concatenate([cont, cat], axis=1).astype(jnp.float32)   # torch.cat([cont, cat], dim=1)
    notes = jnp.asarray(notes, jnp.bfloat16)                       # bf16 MXU operand (f32 accum)
    B = x.shape[0]
    C = int(folded["u_t_s"].shape[0])

    # Batch tile: multiple of 8 sublanes, >=2 grid steps when B allows (v7x megacore),
    # capped at 1024 (double-buffered bf16 (1024,768) notes tile ~3 MiB << scoped VMEM).
    TB = min(1024, _round_up(max(-(-B // 2), 8), 8))
    B_pad = _round_up(B, TB)
    if B_pad != B:
        x = jnp.pad(x, ((0, B_pad - B), (0, 0)))
        notes = jnp.pad(notes, ((0, B_pad - B), (0, 0)))

    weights = [jnp.asarray(folded[k], jnp.bfloat16 if k == "w_notes" else jnp.float32)
               for k in _PARAM_ORDER]

    in_specs = (
        [pl.BlockSpec((TB, x.shape[1]), lambda i: (i, 0)),
         pl.BlockSpec((TB, notes.shape[1]), lambda i: (i, 0))]
        + [pl.BlockSpec(w.shape, lambda i: (0, 0)) for w in weights]   # weights stay resident
    )

    out = pl.pallas_call(
        _enn_fused_kernel,
        out_shape=jax.ShapeDtypeStruct((B_pad, OUT_LANES), jnp.float32),
        grid=(B_pad // TB,),
        in_specs=in_specs,
        out_specs=pl.BlockSpec((TB, OUT_LANES), lambda i: (i, 0)),
        compiler_params=pltpu.CompilerParams(dimension_semantics=("parallel",)),
    )(x, notes, *weights)

    probs = out[:B, 0:C]
    slogits = out[:B, C:2 * C]
    nlogits = out[:B, 2 * C:3 * C]
    uncertainty = out[:B, 3 * C]
    return probs, slogits, nlogits, uncertainty


# --------------------------------- params --------------------------------------------
def init_params(key, hp: HParams):
    """Raw parameters matching the PyTorch module (linear weights stored as (in, out))."""
    d_in = sum(hp.structured_d_in_ls)
    H, Hn, C, P = hp.structured_d_hidden, hp.notes_d_hidden, hp.n_class, hp.prototype_dim
    keys = jax.random.split(key, 16)

    def lin(k, fan_in, fan_out):
        kw, kb = jax.random.split(k)
        lim = 1.0 / np.sqrt(fan_in)
        w = jax.random.uniform(kw, (fan_in, fan_out), jnp.float32, -lim, lim)
        b = jax.random.uniform(kb, (1, fan_out), jnp.float32, -lim, lim)
        return w, b

    p = {}
    p["w0"], p["b0"] = lin(keys[0], d_in, H)
    p["w1"], p["b1"] = lin(keys[1], H, H)
    p["wout"], p["bout"] = lin(keys[2], H, H)
    p["wc"], p["bc"] = lin(keys[3], H, C)
    p["wr"], p["br"] = lin(keys[4], hp.notes_d_in, Hn)
    p["wn"], p["bn"] = lin(keys[5], Hn, C)
    p["proto_s"] = 0.5 * jax.random.normal(keys[6], (P, H), jnp.float32)
    p["xi_s"] = 0.5 * jax.random.normal(keys[7], (1, P), jnp.float32)
    p["eta_s"] = 0.5 * jax.random.normal(keys[8], (1, P), jnp.float32)
    p["beta_s"] = jax.random.normal(keys[9], (P, C), jnp.float32)
    p["proto_n"] = 0.5 * jax.random.normal(keys[10], (P, Hn), jnp.float32)
    p["xi_n"] = 0.5 * jax.random.normal(keys[11], (1, P), jnp.float32)
    p["eta_n"] = 0.5 * jax.random.normal(keys[12], (1, P), jnp.float32)
    p["beta_n"] = jax.random.normal(keys[13], (P, C), jnp.float32)
    return p


def fold_params(raw, dtype=np.float64):
    """Init-time constant folding of all parameter-only math (runs once, in float64)."""
    r = {k: np.asarray(v, dtype) for k, v in raw.items()}
    C = r["wc"].shape[1]
    P = r["proto_s"].shape[0]
    assert P & (P - 1) == 0, "prototype_dim must be a power of 2 for the tree fold"

    f = {"w0": r["w0"], "b0": r["b0"], "w1": r["w1"], "b1": r["b1"]}

    def head_fold(w_head, b_head, w_cls, b_cls, proto):
        # [feats | logits | -2*feats@proto^T + ||proto||^2] as one fused matmul
        pt2 = -2.0 * proto.T                                     # (D, P)
        psq = np.sum(proto * proto, axis=1)[None, :]             # (1, P)
        w = np.concatenate([w_head, w_head @ w_cls, w_head @ pt2], axis=1)
        b = np.concatenate([b_head, b_head @ w_cls + b_cls, b_head @ pt2 + psq], axis=1)
        return w, b

    f["w_feat_cls"], f["b_feat_cls"] = head_fold(r["wout"], r["bout"], r["wc"], r["bc"], r["proto_s"])
    f["w_notes"], f["b_notes"] = head_fold(r["wr"], r["br"], r["wn"], r["bn"], r["proto_n"])

    # per-modality DSM constants (reference-only copies kept in the dict)
    for tag in ("s", "n"):
        beta = r["beta_" + tag]
        f["gamma_" + tag] = r["eta_" + tag] ** 2                          # (1, P)
        f["log_alpha_" + tag] = -np.log1p(np.exp(-r["xi_" + tag]))        # log(sigmoid(xi)), (1, P)
        u = beta * beta / np.sum(beta * beta, axis=1, keepdims=True)      # (P, C)
        f["u_t_" + tag] = np.ascontiguousarray(u.T)                       # (C, P)

    # ---- lane-packed kernel constants --------------------------------------------------
    # packed layout: lane k = q*G + g,   q = prototype, g = group
    #   groups: [s_class0..s_class{C-1}, s_omega, n_class0..n_class{C-1}, n_omega]
    G = 2 * (C + 1)
    R = np.zeros((2 * P, G * P), dtype)       # expansion: s_both (B,2P) @ R -> packed (B,G*P)
    um1 = np.zeros((1, G * P), dtype)         # (u - 1) per packed lane; omega groups use u = 0
    for q in range(P):
        for g in range(G):
            k = q * G + g
            if g <= C:                         # structured modality
                R[q, k] = 1.0
                u_val = f["u_t_s"][g, q] if g < C else 0.0
            else:                              # notes modality
                R[P + q, k] = 1.0
                gc = g - (C + 1)
                u_val = f["u_t_n"][gc, q] if gc < C else 0.0
            um1[0, k] = u_val - 1.0
    f["r_expand"] = R

    const = np.zeros((8, 128), dtype)
    const[0, :2 * P] = np.concatenate([f["gamma_s"][0], f["gamma_n"][0]])
    const[1, :2 * P] = np.concatenate([f["log_alpha_s"][0], f["log_alpha_n"][0]])
    const[2, :G * P] = um1[0]
    f["dsm_const"] = const
    return f


# ------------------------------ references -------------------------------------------
def folded_forward(xp, p, x, notes, n_class, notes_matmul_bf16=False):
    """Forward on the folded params, mirroring the kernel's op structure (xp = np or jnp)."""
    C = n_class
    P = p["r_expand"].shape[0] // 2
    H = p["w_feat_cls"].shape[1] - C - P
    Hn = p["w_notes"].shape[1] - C - P

    h = xp.maximum(x @ p["w0"] + p["b0"], 0.0)
    h = xp.maximum(h @ p["w1"] + p["b1"], 0.0)
    fused_s = h @ p["w_feat_cls"] + p["b_feat_cls"]
    feats, slogits, cross_s = fused_s[:, :H], fused_s[:, H:H + C], fused_s[:, H + C:H + C + P]

    if notes_matmul_bf16:
        fused_n = jnp.dot(notes.astype(jnp.bfloat16), p["w_notes"].astype(jnp.bfloat16),
                          preferred_element_type=jnp.float32) + p["b_notes"]
    else:
        fused_n = notes @ p["w_notes"] + p["b_notes"]
    reduced, nlogits, cross_n = fused_n[:, :Hn], fused_n[:, Hn:Hn + C], fused_n[:, Hn + C:Hn + C + P]

    def dsm(f, cross, gamma, log_alpha, u_t):
        fsq = xp.sum(f * f, axis=1, keepdims=True)
        d = xp.maximum(fsq + cross, 0.0)
        s = xp.exp(log_alpha - gamma * d)                                   # (B, P)
        one_minus_s = 1.0 - s
        terms = s[:, None, :] * u_t[None, :, :] + one_minus_s[:, None, :]   # (B, C, P)
        om = xp.prod(one_minus_s, axis=1, keepdims=True)
        return xp.prod(terms, axis=2) - om, om                              # unnormalized masses

    m_s, om_s = dsm(feats, cross_s, p["gamma_s"], p["log_alpha_s"], p["u_t_s"])
    m_n, om_n = dsm(reduced, cross_n, p["gamma_n"], p["log_alpha_n"], p["u_t_n"])
    M = m_s * (m_n + om_n) + om_s * m_n
    M_om = om_s * om_n
    inv = 1.0 / (xp.sum(M, axis=1, keepdims=True) + M_om + _EPS)
    probs = (M + (1.0 / C) * M_om) * inv
    return probs, slogits, nlogits, (M_om * inv)[:, 0]


def original_forward_np(raw, cont, cat, notes, n_class):
    """Original (unfolded) module structure in numpy float64 — validates the folding algebra."""
    p = {k: np.asarray(v, np.float64) for k, v in raw.items()}
    x = np.concatenate([np.asarray(cont, np.float64), np.asarray(cat, np.float64)], axis=1)
    notes = np.asarray(notes, np.float64)

    def dsm(f, proto, xi, eta, beta):
        d = np.sum((f[:, None, :] - proto[None, :, :]) ** 2, axis=-1)
        s = (1.0 / (1.0 + np.exp(-xi))) * np.exp(-(eta ** 2) * d)
        u = beta ** 2 / np.sum(beta ** 2, axis=1, keepdims=True)
        prod_sc = np.ones((f.shape[0], n_class))
        prod_om = np.ones((f.shape[0], 1))
        for q in range(proto.shape[0]):
            sq = s[:, q:q + 1]
            prod_sc = prod_sc * (sq * u[q:q + 1, :] + (1.0 - sq))
            prod_om = prod_om * (1.0 - sq)
        m_sing = prod_sc - prod_om
        tot = np.sum(m_sing, axis=1, keepdims=True) + prod_om + _EPS
        return m_sing / tot, prod_om / tot

    h = np.maximum(x @ p["w0"] + p["b0"], 0.0)
    h = np.maximum(h @ p["w1"] + p["b1"], 0.0)
    feats = h @ p["wout"] + p["bout"]
    slogits = feats @ p["wc"] + p["bc"]
    s_sing, s_om = dsm(feats, p["proto_s"], p["xi_s"], p["eta_s"], p["beta_s"])

    reduced = notes @ p["wr"] + p["br"]
    nlogits = reduced @ p["wn"] + p["bn"]
    n_sing, n_om = dsm(reduced, p["proto_n"], p["xi_n"], p["eta_n"], p["beta_n"])

    comb_sing = s_sing * n_sing + s_sing * n_om + s_om * n_sing
    comb_om = s_om * n_om
    tot = np.sum(comb_sing, axis=1, keepdims=True) + comb_om + _EPS
    comb_sing, comb_om = comb_sing / tot, comb_om / tot
    probs = comb_sing + (1.0 / n_class) * comb_om
    return probs, slogits, nlogits, comb_om[:, 0]


# ----------------------------------- main ---------------------------------------------
if __name__ == "__main__":
    hp = HParams()
    key = jax.random.PRNGKey(0)
    kp, kc, kk, kn = jax.random.split(key, 4)

    raw = init_params(kp, hp)

    B = 8   # multiple of 8 sublanes
    cont = jax.random.normal(kc, (B, hp.structured_d_in_ls[0]), jnp.float32)
    cat = jax.random.normal(kk, (B, hp.structured_d_in_ls[1]), jnp.float32)
    notes = jax.random.normal(kn, (B, hp.notes_d_in), jnp.float32)

    # init-time constant folding (float64, once; nothing is recomputed per call)
    folded64 = fold_params(raw)
    folded32 = {k: jnp.asarray(np.asarray(v), jnp.float32) for k, v in folded64.items()}

    # check 1: folding / matmul-distance / lane-packing algebra vs the original module (float64)
    x64 = np.concatenate([np.asarray(cont, np.float64), np.asarray(cat, np.float64)], axis=1)
    n64 = np.asarray(notes, np.float64)
    for a, b in zip(folded_forward(np, folded64, x64, n64, hp.n_class),
                    original_forward_np(raw, cont, cat, notes, hp.n_class)):
        np.testing.assert_allclose(a, b, rtol=1e-9, atol=1e-9)

    # run the fused Pallas kernel
    outs = mlp_enn_one_structured_forward(folded32, cont, cat, notes)
    outs = jax.block_until_ready(outs)

    # check 2: kernel vs a same-structure JAX reference that mirrors the bf16 notes matmul.
    # tolerance budget: approx EUP reciprocal (~1e-3 rel) + matmul/exp lowering & reassociation
    # differences between Mosaic and XLA (~1e-3); layout/indexing bugs would be O(0.1-1).
    x32 = jnp.concatenate([cont, cat], axis=1)
    refs = folded_forward(jnp, folded32, x32, notes, hp.n_class, notes_matmul_bf16=True)
    for got, ref in zip(outs, refs):
        np.testing.assert_allclose(np.asarray(got), np.asarray(ref), rtol=5e-3, atol=5e-3)

    print("KERNEL_OK")
</pallas_src>

<mosaic_0001>
module attributes {stable_mosaic.version = 11 : i64} {
  func.func @_enn_fused_kernel(%arg0: i32, %arg1: memref<8x16xf32, #tpu.memory_space<vmem>>, %arg2: memref<8x768xbf16, #tpu.memory_space<vmem>>, %arg3: memref<16x32xf32, #tpu.memory_space<vmem>>, %arg4: memref<1x32xf32, #tpu.memory_space<vmem>>, %arg5: memref<32x32xf32, #tpu.memory_space<vmem>>, %arg6: memref<1x32xf32, #tpu.memory_space<vmem>>, %arg7: memref<32x44xf32, #tpu.memory_space<vmem>>, %arg8: memref<1x44xf32, #tpu.memory_space<vmem>>, %arg9: memref<768x44xbf16, #tpu.memory_space<vmem>>, %arg10: memref<1x44xf32, #tpu.memory_space<vmem>>, %arg11: memref<16x80xf32, #tpu.memory_space<vmem>>, %arg12: memref<8x128xf32, #tpu.memory_space<vmem>>, %arg13: memref<8x128xf32, #tpu.memory_space<vmem>>) attributes {dimension_semantics = [#tpu.dimension_semantics<parallel>], iteration_bounds = array<i64: 1>, scalar_prefetch = 0 : i64, scratch_operands = 0 : i64, tpu.core_type = #tpu.core_type<tc>, window_params = [{transform_indices = @transform_0, window_bounds = array<i64: 8, 16>}, {transform_indices = @transform_1, window_bounds = array<i64: 8, 768>}, {pipeline_mode = #tpu.pipeline_mode<synchronous>, transform_indices = @transform_2, window_bounds = array<i64: 16, 32>}, {pipeline_mode = #tpu.pipeline_mode<synchronous>, transform_indices = @transform_3, window_bounds = array<i64: 1, 32>}, {pipeline_mode = #tpu.pipeline_mode<synchronous>, transform_indices = @transform_4, window_bounds = array<i64: 32, 32>}, {pipeline_mode = #tpu.pipeline_mode<synchronous>, transform_indices = @transform_5, window_bounds = array<i64: 1, 32>}, {pipeline_mode = #tpu.pipeline_mode<synchronous>, transform_indices = @transform_6, window_bounds = array<i64: 32, 44>}, {pipeline_mode = #tpu.pipeline_mode<synchronous>, transform_indices = @transform_7, window_bounds = array<i64: 1, 44>}, {pipeline_mode = #tpu.pipeline_mode<synchronous>, transform_indices = @transform_8, window_bounds = array<i64: 768, 44>}, {pipeline_mode = #tpu.pipeline_mode<synchronous>, transform_indices = @transform_9, window_bounds = array<i64: 1, 44>}, {pipeline_mode = #tpu.pipeline_mode<synchronous>, transform_indices = @transform_10, window_bounds = array<i64: 16, 80>}, {pipeline_mode = #tpu.pipeline_mode<synchronous>, transform_indices = @transform_11, window_bounds = array<i64: 8, 128>}, {transform_indices = @transform_12, window_bounds = array<i64: 8, 128>}]} {
    %c0 = arith.constant 0 : index
    %c0_0 = arith.constant 0 : index
    %0 = vector.load %arg1[%c0, %c0_0] : memref<8x16xf32, #tpu.memory_space<vmem>>, vector<8x16xf32>
    %c0_1 = arith.constant 0 : index
    %c0_2 = arith.constant 0 : index
    %1 = vector.load %arg3[%c0_1, %c0_2] : memref<16x32xf32, #tpu.memory_space<vmem>>, vector<16x32xf32>
    %cst = arith.constant dense<0.000000e+00> : vector<8x32xf32>
    %2 = tpu.matmul %0, %1, %cst {dimension_numbers = #tpu.dot_dimension_numbers<[1], [0], [0], [1], [0, 0, 1, 1], [], []>} : vector<8x16xf32>, vector<16x32xf32>, vector<8x32xf32> -> vector<8x32xf32>
    %c0_3 = arith.constant 0 : index
    %c0_4 = arith.constant 0 : index
    %3 = vector.load %arg4[%c0_3, %c0_4] : memref<1x32xf32, #tpu.memory_space<vmem>>, vector<1x32xf32>
    %4 = vector.broadcast %3 : vector<1x32xf32> to vector<8x32xf32>
    %5 = arith.addf %2, %4 : vector<8x32xf32>
    %cst_5 = arith.constant 0.000000e+00 : f32
    %6 = vector.broadcast %cst_5 : f32 to vector<8x32xf32>
    %7 = arith.maximumf %5, %6 : vector<8x32xf32>
    %c0_6 = arith.constant 0 : index
    %c0_7 = arith.constant 0 : index
    %8 = vector.load %arg5[%c0_6, %c0_7] : memref<32x32xf32, #tpu.memory_space<vmem>>, vector<32x32xf32>
    %cst_8 = arith.constant dense<0.000000e+00> : vector<8x32xf32>
    %9 = tpu.matmul %7, %8, %cst_8 {dimension_numbers = #tpu.dot_dimension_numbers<[1], [0], [0], [1], [0, 0, 1, 1], [], []>} : vector<8x32xf32>, vector<32x32xf32>, vector<8x32xf32> -> vector<8x32xf32>
    %c0_9 = arith.constant 0 : index
    %c0_10 = arith.constant 0 : index
    %10 = vector.load %arg6[%c0_9, %c0_10] : memref<1x32xf32, #tpu.memory_space<vmem>>, vector<1x32xf32>
    %11 = vector.broadcast %10 : vector<1x32xf32> to vector<8x32xf32>
    %12 = arith.addf %9, %11 : vector<8x32xf32>
    %cst_11 = arith.constant 0.000000e+00 : f32
    %13 = vector.broadcast %cst_11 : f32 to vector<8x32xf32>
    %14 = arith.maximumf %12, %13 : vector<8x32xf32>
    %c0_12 = arith.constant 0 : index
    %c0_13 = arith.constant 0 : index
    %15 = vector.load %arg7[%c0_12, %c0_13] : memref<32x44xf32, #tpu.memory_space<vmem>>, vector<32x44xf32>
    %cst_14 = arith.constant dense<0.000000e+00> : vector<8x44xf32>
    %16 = tpu.matmul %14, %15, %cst_14 {dimension_numbers = #tpu.dot_dimension_numbers<[1], [0], [0], [1], [0, 0, 1, 1], [], []>} : vector<8x32xf32>, vector<32x44xf32>, vector<8x44xf32> -> vector<8x44xf32>
    %c0_15 = arith.constant 0 : index
    %c0_16 = arith.constant 0 : index
    %17 = vector.load %arg8[%c0_15, %c0_16] : memref<1x44xf32, #tpu.memory_space<vmem>>, vector<1x44xf32>
    %18 = vector.broadcast %17 : vector<1x44xf32> to vector<8x44xf32>
    %19 = arith.addf %16, %18 : vector<8x44xf32>
    %20 = vector.extract_strided_slice %19 {offsets = [0, 0], sizes = [8, 32], strides = [1, 1]} : vector<8x44xf32> to vector<8x32xf32>
    %21 = vector.extract_strided_slice %19 {offsets = [0, 32], sizes = [8, 4], strides = [1, 1]} : vector<8x44xf32> to vector<8x4xf32>
    %22 = vector.extract_strided_slice %19 {offsets = [0, 36], sizes = [8, 8], strides = [1, 1]} : vector<8x44xf32> to vector<8x8xf32>
    %c0_17 = arith.constant 0 : index
    %c0_18 = arith.constant 0 : index
    %23 = vector.load %arg2[%c0_17, %c0_18] : memref<8x768xbf16, #tpu.memory_space<vmem>>, vector<8x768xbf16>
    %c0_19 = arith.constant 0 : index
    %c0_20 = arith.constant 0 : index
    %24 = vector.load %arg9[%c0_19, %c0_20] : memref<768x44xbf16, #tpu.memory_space<vmem>>, vector<768x44xbf16>
    %cst_21 = arith.constant dense<0.000000e+00> : vector<8x44xf32>
    %25 = tpu.matmul %23, %24, %cst_21 {dimension_numbers = #tpu.dot_dimension_numbers<[1], [0], [0], [1], [0, 0, 1, 1], [], []>} : vector<8x768xbf16>, vector<768x44xbf16>, vector<8x44xf32> -> vector<8x44xf32>
    %c0_22 = arith.constant 0 : index
    %c0_23 = arith.constant 0 : index
    %26 = vector.load %arg10[%c0_22, %c0_23] : memref<1x44xf32, #tpu.memory_space<vmem>>, vector<1x44xf32>
    %27 = vector.broadcast %26 : vector<1x44xf32> to vector<8x44xf32>
    %28 = arith.addf %25, %27 : vector<8x44xf32>
    %29 = vector.extract_strided_slice %28 {offsets = [0, 0], sizes = [8, 32], strides = [1, 1]} : vector<8x44xf32> to vector<8x32xf32>
    %30 = vector.extract_strided_slice %28 {offsets = [0, 32], sizes = [8, 4], strides = [1, 1]} : vector<8x44xf32> to vector<8x4xf32>
    %31 = vector.extract_strided_slice %28 {offsets = [0, 36], sizes = [8, 8], strides = [1, 1]} : vector<8x44xf32> to vector<8x8xf32>
    %32 = arith.mulf %20, %20 : vector<8x32xf32>
    %cst_24 = arith.constant dense<0.000000e+00> : vector<8xf32>
    %33 = vector.multi_reduction <add>, %32, %cst_24 [1] : vector<8x32xf32> to vector<8xf32>
    %34 = vector.shape_cast %33 : vector<8xf32> to vector<8x1xf32>
    %35 = arith.mulf %29, %29 : vector<8x32xf32>
    %cst_25 = arith.constant dense<0.000000e+00> : vector<8xf32>
    %36 = vector.multi_reduction <add>, %35, %cst_25 [1] : vector<8x32xf32> to vector<8xf32>
    %37 = vector.shape_cast %36 : vector<8xf32> to vector<8x1xf32>
    %38 = vector.broadcast %34 : vector<8x1xf32> to vector<8x8xf32>
    %39 = arith.addf %38, %22 : vector<8x8xf32>
    %cst_26 = arith.constant 0.000000e+00 : f32
    %40 = vector.broadcast %cst_26 : f32 to vector<8x8xf32>
    %41 = arith.maximumf %39, %40 : vector<8x8xf32>
    %42 = vector.broadcast %37 : vector<8x1xf32> to vector<8x8xf32>
    %43 = arith.addf %42, %31 : vector<8x8xf32>
    %cst_27 = arith.constant 0.000000e+00 : f32
    %44 = vector.broadcast %cst_27 : f32 to vector<8x8xf32>
    %45 = arith.maximumf %43, %44 : vector<8x8xf32>
    %46 = tpu.concatenate %41, %45 in 1 : vector<8x8xf32>, vector<8x8xf32> -> vector<8x16xf32>
    %c0_28 = arith.constant 0 : index
    %c0_29 = arith.constant 0 : index
    %47 = vector.load %arg12[%c0_28, %c0_29] : memref<8x128xf32, #tpu.memory_space<vmem>>, vector<1x16xf32>
    %c1 = arith.constant 1 : index
    %c0_30 = arith.constant 0 : index
    %48 = vector.load %arg12[%c1, %c0_30] : memref<8x128xf32, #tpu.memory_space<vmem>>, vector<1x16xf32>
    %49 = vector.broadcast %47 : vector<1x16xf32> to vector<8x16xf32>
    %50 = arith.mulf %49, %46 : vector<8x16xf32>
    %51 = vector.broadcast %48 : vector<1x16xf32> to vector<8x16xf32>
    %52 = arith.subf %51, %50 : vector<8x16xf32>
    %53 = math.exp %52 : vector<8x16xf32>
    %c0_31 = arith.constant 0 : index
    %c0_32 = arith.constant 0 : index
    %54 = vector.load %arg11[%c0_31, %c0_32] : memref<16x80xf32, #tpu.memory_space<vmem>>, vector<16x80xf32>
    %cst_33 = arith.constant dense<0.000000e+00> : vector<8x80xf32>
    %55 = tpu.matmul %53, %54, %cst_33 {dimension_numbers = #tpu.dot_dimension_numbers<[1], [0], [0], [1], [0, 0, 1, 1], [], []>} : vector<8x16xf32>, vector<16x80xf32>, vector<8x80xf32> -> vector<8x80xf32>
    %c2 = arith.constant 2 : index
    %c0_34 = arith.constant 0 : index
    %56 = vector.load %arg12[%c2, %c0_34] : memref<8x128xf32, #tpu.memory_space<vmem>>, vector<1x80xf32>
    %57 = vector.broadcast %56 : vector<1x80xf32> to vector<8x80xf32>
    %58 = arith.mulf %55, %57 : vector<8x80xf32>
    %cst_35 = arith.constant 1.000000e+00 : f32
    %59 = vector.broadcast %cst_35 : f32 to vector<8x80xf32>
    %60 = arith.addf %58, %59 : vector<8x80xf32>
    %61 = vector.extract_strided_slice %60 {offsets = [0, 0], sizes = [8, 40], strides = [1, 1]} : vector<8x80xf32> to vector<8x40xf32>
    %62 = vector.extract_strided_slice %60 {offsets = [0, 40], sizes = [8, 40], strides = [1, 1]} : vector<8x80xf32> to vector<8x40xf32>
    %63 = arith.mulf %61, %62 : vector<8x40xf32>
    %64 = vector.extract_strided_slice %63 {offsets = [0, 0], sizes = [8, 20], strides = [1, 1]} : vector<8x40xf32> to vector<8x20xf32>
    %65 = vector.extract_strided_slice %63 {offsets = [0, 20], sizes = [8, 20], strides = [1, 1]} : vector<8x40xf32> to vector<8x20xf32>
    %66 = arith.mulf %64, %65 : vector<8x20xf32>
    %67 = vector.extract_strided_slice %66 {offsets = [0, 0], sizes = [8, 10], strides = [1, 1]} : vector<8x20xf32> to vector<8x10xf32>
    %68 = vector.extract_strided_slice %66 {offsets = [0, 10], sizes = [8, 10], strides = [1, 1]} : vector<8x20xf32> to vector<8x10xf32>
    %69 = arith.mulf %67, %68 : vector<8x10xf32>
    %70 = vector.extract_strided_slice %69 {offsets = [0, 0], sizes = [8, 4], strides = [1, 1]} : vector<8x10xf32> to vector<8x4xf32>
    %71 = vector.extract_strided_slice %69 {offsets = [0, 4], sizes = [8, 1], strides = [1, 1]} : vector<8x10xf32> to vector<8x1xf32>
    %72 = vector.broadcast %71 : vector<8x1xf32> to vector<8x4xf32>
    %73 = arith.subf %70, %72 : vector<8x4xf32>
    %74 = vector.extract_strided_slice %69 {offsets = [0, 4], sizes = [8, 1], strides = [1, 1]} : vector<8x10xf32> to vector<8x1xf32>
    %75 = vector.extract_strided_slice %69 {offsets = [0, 5], sizes = [8, 4], strides = [1, 1]} : vector<8x10xf32> to vector<8x4xf32>
    %76 = vector.extract_strided_slice %69 {offsets = [0, 9], sizes = [8, 1], strides = [1, 1]} : vector<8x10xf32> to vector<8x1xf32>
    %77 = vector.broadcast %76 : vector<8x1xf32> to vector<8x4xf32>
    %78 = arith.subf %75, %77 : vector<8x4xf32>
    %79 = vector.extract_strided_slice %69 {offsets = [0, 9], sizes = [8, 1], strides = [1, 1]} : vector<8x10xf32> to vector<8x1xf32>
    %80 = vector.broadcast %79 : vector<8x1xf32> to vector<8x4xf32>
    %81 = arith.addf %78, %80 : vector<8x4xf32>
    %82 = arith.mulf %73, %81 : vector<8x4xf32>
    %83 = vector.broadcast %74 : vector<8x1xf32> to vector<8x4xf32>
    %84 = arith.mulf %83, %78 : vector<8x4xf32>
    %85 = arith.addf %82, %84 : vector<8x4xf32>
    %86 = arith.mulf %74, %79 : vector<8x1xf32>
    %cst_36 = arith.constant dense<0.000000e+00> : vector<8xf32>
    %87 = vector.multi_reduction <add>, %85, %cst_36 [1] : vector<8x4xf32> to vector<8xf32>
    %88 = vector.shape_cast %87 : vector<8xf32> to vector<8x1xf32>
    %89 = arith.addf %88, %86 : vector<8x1xf32>
    %cst_37 = arith.constant 1.000000e-30 : f32
    %90 = vector.broadcast %cst_37 : f32 to vector<8x1xf32>
    %91 = arith.addf %89, %90 : vector<8x1xf32>
    %92 = tpu.reciprocal %91 {approx = true} : vector<8x1xf32> -> vector<8x1xf32>
    %cst_38 = arith.constant 2.500000e-01 : f32
    %93 = vector.broadcast %cst_38 : f32 to vector<8x1xf32>
    %94 = arith.mulf %86, %93 : vector<8x1xf32>
    %95 = vector.broadcast %94 : vector<8x1xf32> to vector<8x4xf32>
    %96 = arith.addf %85, %95 : vector<8x4xf32>
    %97 = vector.broadcast %92 : vector<8x1xf32> to vector<8x4xf32>
    %98 = arith.mulf %96, %97 : vector<8x4xf32>
    %99 = arith.mulf %86, %92 : vector<8x1xf32>
    %cst_39 = arith.constant 0.000000e+00 : f32
    %100 = vector.broadcast %cst_39 : f32 to vector<8x115xf32>
    %101 = tpu.concatenate %98, %21, %30, %99, %100 in 1 : vector<8x4xf32>, vector<8x4xf32>, vector<8x4xf32>, vector<8x1xf32>, vector<8x115xf32> -> vector<8x128xf32>
    %c0_40 = arith.constant 0 : index
    %c0_41 = arith.constant 0 : index
    %102 = vector.load %arg13[%c0_40, %c0_41] : memref<8x128xf32, #tpu.memory_space<vmem>>, vector<8x128xf32>
    tpu.vector_store %arg13[%c0_40, %c0_41], %101 {strides = array<i32>} : memref<8x128xf32, #tpu.memory_space<vmem>>, vector<8x128xf32>,
    return
  }
  func.func @transform_0(%arg0: i32) -> (i32, i32) {
    %c0_i32 = arith.constant 0 : i32
    %c0_i32_0 = arith.constant 0 : i32
    return %arg0, %c0_i32 : i32, i32
  }
  func.func @transform_1(%arg0: i32) -> (i32, i32) {
    %c0_i32 = arith.constant 0 : i32
    %c0_i32_0 = arith.constant 0 : i32
    return %arg0, %c0_i32 : i32, i32
  }
  func.func @transform_2(%arg0: i32) -> (i32, i32) {
    %c0_i32 = arith.constant 0 : i32
    %c0_i32_0 = arith.constant 0 : i32
    %c0_i32_1 = arith.constant 0 : i32
    return %c0_i32, %c0_i32_0 : i32, i32
  }
  func.func @transform_3(%arg0: i32) -> (i32, i32) {
    %c0_i32 = arith.constant 0 : i32
    %c0_i32_0 = arith.constant 0 : i32
    %c0_i32_1 = arith.constant 0 : i32
    return %c0_i32, %c0_i32_0 : i32, i32
  }
  func.func @transform_4(%arg0: i32) -> (i32, i32) {
    %c0_i32 = arith.constant 0 : i32
    %c0_i32_0 = arith.constant 0 : i32
    %c0_i32_1 = arith.constant 0 : i32
    return %c0_i32, %c0_i32_0 : i32, i32
  }
  func.func @transform_5(%arg0: i32) -> (i32, i32) {
    %c0_i32 = arith.constant 0 : i32
    %c0_i32_0 = arith.constant 0 : i32
    %c0_i32_1 = arith.constant 0 : i32
    return %c0_i32, %c0_i32_0 : i32, i32
  }
  func.func @transform_6(%arg0: i32) -> (i32, i32) {
    %c0_i32 = arith.constant 0 : i32
    %c0_i32_0 = arith.constant 0 : i32
    %c0_i32_1 = arith.constant 0 : i32
    return %c0_i32, %c0_i32_0 : i32, i32
  }
  func.func @transform_7(%arg0: i32) -> (i32, i32) {
    %c0_i32 = arith.constant 0 : i32
    %c0_i32_0 = arith.constant 0 : i32
    %c0_i32_1 = arith.constant 0 : i32
    return %c0_i32, %c0_i32_0 : i32, i32
  }
  func.func @transform_8(%arg0: i32) -> (i32, i32) {
    %c0_i32 = arith.constant 0 : i32
    %c0_i32_0 = arith.constant 0 : i32
    %c0_i32_1 = arith.constant 0 : i32
    return %c0_i32, %c0_i32_0 : i32, i32
  }
  func.func @transform_9(%arg0: i32) -> (i32, i32) {
    %c0_i32 = arith.constant 0 : i32
    %c0_i32_0 = arith.constant 0 : i32
    %c0_i32_1 = arith.constant 0 : i32
    return %c0_i32, %c0_i32_0 : i32, i32
  }
  func.func @transform_10(%arg0: i32) -> (i32, i32) {
    %c0_i32 = arith.constant 0 : i32
    %c0_i32_0 = arith.constant 0 : i32
    %c0_i32_1 = arith.constant 0 : i32
    return %c0_i32, %c0_i32_0 : i32, i32
  }
  func.func @transform_11(%arg0: i32) -> (i32, i32) {
    %c0_i32 = arith.constant 0 : i32
    %c0_i32_0 = arith.constant 0 : i32
    %c0_i32_1 = arith.constant 0 : i32
    return %c0_i32, %c0_i32_0 : i32, i32
  }
  func.func @transform_12(%arg0: i32) -> (i32, i32) {
    %c0_i32 = arith.constant 0 : i32
    %c0_i32_0 = arith.constant 0 : i32
    return %arg0, %c0_i32 : i32, i32
  }
}

</mosaic_0001>

<bundles_post_ra>
// kernel: tpu_custom_call.1
= control target key start
LH: loop header
LB: loop body
LE: loop exit
PB: predicated region body
PF: predicated region fallthrough
CT: control target
= control target key end

     0   :  { %v1347_v2 = vmov 0.0|0.0   ;;  %vm1348_vm0 = vmmov 0   ;;  %v1349_v4 = vmov 0.0   ;;  %vm53_vm1 = vcmask 130048   ;;  %s1689_s0 = inlined_call_operand.vmem [shape: f32[8,16], index: 0, kind: input, shape index: {}]   ;;  %s1690_s1 = inlined_call_operand.vmem [shape: bf16[8,768], index: 1, kind: input, shape index: {}]   ;;  %s1691_s2 = inlined_call_operand.vmem [shape: f32[16,32], index: 2, kind: input, shape index: {}]   ;;  %s1692_s3 = inlined_call_operand.vmem [shape: f32[1,32], index: 3, kind: input, shape index: {}]   ;;  %s1693_s4 = inlined_call_operand.vmem [shape: f32[32,32], index: 4, kind: input, shape index: {}]   ;;  %s1694_s5 = inlined_call_operand.vmem [shape: f32[1,32], index: 5, kind: input, shape index: {}]   ;;  %s1695_s6 = inlined_call_operand.vmem [shape: f32[32,44], index: 6, kind: input, shape index: {}]   ;;  %s1696_s7 = inlined_call_operand.vmem [shape: f32[1,44], index: 7, kind: input, shape index: {}]   ;;  %s1697_s8 = inlined_call_operand.vmem [shape: bf16[768,44], index: 8, kind: input, shape index: {}]   ;;  %s1698_s9 = inlined_call_operand.vmem [shape: f32[1,44], index: 9, kind: input, shape index: {}]   ;;  %s1699_s10 = inlined_call_operand.vmem [shape: f32[16,80], index: 10, kind: input, shape index: {}]   ;;  %s1700_s11 = inlined_call_operand.vmem [shape: f32[8,128], index: 11, kind: input, shape index: {}]   ;;  %s1701_s12 = inlined_call_operand.hbm [shape: f32[8,128], index: 12, kind: output, shape index: {}]  }
   0x1   :  { %v44_v0 = vld [vmem:[%s1691_s2] sm:$0xff]  ;;  %v45_v1 = vld [vmem:[%s1691_s2 + $0x8] sm:$0xff]  ;;  %1230 = vmatprep.subr.bf16.mxu0 %v1347_v2  ;;  %1198 = vmatprep.mubr.msk.f32.mxu0 %vm1348_vm0, %v1349_v4 }
   0x2   :  { %v1231_v3 = vpack.c.bf16 %v45_v1, %v44_v0  ;;  %v43_v5 = vld [vmem:[%s1689_s0] sm:$0xff]  ;;  %v129_v7 = vld [vmem:[%s1693_s4 + $0x8] sm:$0xff] }
   0x3   :  { %v128_v6 = vld [vmem:[%s1693_s4] sm:$0xff] }
   0x4   :  { %1232 = vmatpush3.bf16.msra.mxu0 %v1231_v3  ;;  %v1234_v8 = vpack.c.bf16 %v129_v7, %v128_v6 }
   0x5   :  { %1233 = vmatprep.subr.bf16.mxu0 %v1347_v2 }
   0x7   :  { %1199 = vmatmul.mubr.msk.f32.vlgmr.msra.gmra.mrb[0].mxu0 %vm53_vm1, %v43_v5 }
   0x8   :  { %1235 = vmatpush3.bf16.msra.mxu0 %v1234_v8  ;;  %1209 = vmatprep.mubr.msk.f32.mxu0 %vm1348_vm0, %v1349_v4 }
   0x9   :  { %1236 = vmatprep.subr.bf16.mxu0 %v1347_v2 }
   0xa   :  { %17 = vsyncpa [#allocation3], 0  ;;  %v130_v9 = vld [vmem:[%s1693_s4 + $0x10] sm:$0xff]  ;;  %v131_v10 = vld [vmem:[%s1693_s4 + $0x18] sm:$0xff]  ;;  %vm139_vm2 = vcmask 261120   ;;  %s1351_s19 = smov 100  }
   0xb   :  { %v1237_v11 = vpack.c.bf16 %v131_v10, %v130_v9  ;;  %v1265_v12 = vld [vmem:[%s1697_s8 + $0x40] sm:$0xff]   ;;  %v1267_v14 = vld [vmem:[%s1697_s8 + $0x48] sm:$0xff]   ;;  %v1269_v16 = vld [vmem:[%s1697_s8 + $0x50] sm:$0xff]   ;;  %vm853_vm3 = vcmask 64512   ;;  %s1352_s23 = smov 88   ;;  %s1353_s24 = smov 108  }
   0xc   :  { %v1266_v13 = vld [vmem:[%s1697_s8] sm:$0xff]   ;;  %1125 = vmatprep.subr.bf16.mxu1 %v1265_v12  ;;  %v1268_v15 = vld [vmem:[%s1697_s8 + $0x8] sm:$0xff]   ;;  %v1270_v17 = vld [vmem:[%s1697_s8 + $0x10] sm:$0xff]   ;;  %s1356_s25 = smov 118   ;;  %vm993_vm4 = vcmask 31744   ;;  %s1358_s26 = smov 104  }
   0xd   :  { %1238 = vmatpush3.bf16.msra.mxu0 %v1237_v11  ;;  %1126 = vmatpush3.bf16.msra.mxu1 %v1266_v13  ;;  %v1271_v18 = vld [vmem:[%s1697_s8 + $0x58] sm:$0xff]   ;;  %v1273_v20 = vld [vmem:[%s1697_s8 + $0x60] sm:$0xff]   ;;  %v1275_v22 = vld [vmem:[%s1697_s8 + $0x68] sm:$0xff]   ;;  %s1359_s27 = smov 8   ;;  %vm1028_vm5 = vcmask 97280   ;;  %s1360_s28 = smov [#allocation2]  }
   0xe   :  { %1239 = vmatprep.subr.bf16.mxu0 %v1347_v2  ;;  %1127 = vmatprep.subr.bf16.mxu1 %v1267_v14  ;;  %v1272_v19 = vld [vmem:[%s1697_s8 + $0x18] sm:$0xff]   ;;  %v1274_v21 = vld [vmem:[%s1697_s8 + $0x20] sm:$0xff]   ;;  %v1276_v23 = vld [vmem:[%s1697_s8 + $0x28] sm:$0xff]   ;;  %vm1030_vm6 = vcmask 105472  }
   0xf   :  { %v1277_v24 = vld [vmem:[%s1697_s8 + $0x70] sm:$0xff]   ;;  %v1279_v26 = vld [vmem:[%s1697_s8 + $0x78] sm:$0xff]   ;;  %v1047_v27 = vld [vmem:[%s1692_s3] ss:$0 sm:$0xff]  ;;  %s1039_s3 = sshll.u32 %s1360_s28, 4  ;;  %s1040_s3 = int_to_ptr.vmem [resolvable:$true] %s1039_s3 }
  0x10   :  { %v1278_v25 = vld [vmem:[%s1697_s8 + $0x30] sm:$0xff]   ;;  %v214_v28 = vld [vmem:[%s1695_s6] sm:$0xff]  ;;  %v215_v29 = vld [vmem:[%s1695_s6 + $0x8] sm:$0xff]  ;;  %s1323_s29 = scalar_lea.vmem %s1040_s3, 128  ;;  %p1328_p1 = scmp.lt.s32.totalorder %s1040_s3, %s1040_s3 }
  0x11   :  { %1128 = vmatpush3.bf16.msra.mxu1 %v1268_v15  ;;  %v1240_v33 = vpack.c.bf16 %v215_v29, %v214_v28  ;;  %v1280_v35 = vld [vmem:[%s1697_s8 + $0x38] sm:$0xff]   ;;  %v216_v36 = vld [vmem:[%s1695_s6 + $0x10] sm:$0xff]  ;;  %v298_v39 = vld [vmem:[%s1690_s1] sm:$0xff]  ;;  %p1324_p0 = scmp.ne.s32.totalorder %s1040_s3, %s1323_s29  ;;  %p1329_p2 = scmp.lt.s32.totalorder %s1323_s29, %s1323_s29 }
  0x12   :  { %1129 = vmatprep.subr.bf16.mxu1 %v1269_v16  ;;  %v217_v37 = vld [vmem:[%s1695_s6 + $0x18] sm:$0xff]  ;;  %v1055_v40 = vcombine.high %v298_v39, %v298_v39  ;;  %v1283_v41 = vld [vmem:[%s1697_s8 + $0x140] sm:$0xff]   ;;  %v1054_v42 = vcombine.low %v298_v39, %v298_v39  ;;  %v1287_v45 = vld [vmem:[%s1697_s8 + $0x148] sm:$0xff]  }
  0x13   :  { %v1243_v38 = vpack.c.bf16 %v217_v37, %v216_v36  ;;  %v1284_v43 = vld [vmem:[%s1697_s8 + $0xc0] sm:$0xff]   ;;  %v1289_v46 = vld [vmem:[%s1697_s8 + $0x108] sm:$0xff]   ;;  %v1291_v47 = vld [vmem:[%s1697_s8 + $0x150] sm:$0xff]   ;;  %p1330_p3 = por %p1329_p2, %p1328_p1 }
  0x14   :  { %v1285_v44 = vld [vmem:[%s1697_s8 + $0x100] sm:$0xff]   ;;  %745 = vmatprep.mubr.bf16.mxu1 %v1055_v40  ;;  %v1293_v48 = vld [vmem:[%s1697_s8 + $0x110] sm:$0xff]   ;;  %v1295_v49 = vld [vmem:[%s1697_s8 + $0x158] sm:$0xff]  }
  0x15   :  { %1130 = vmatpush3.bf16.msra.mxu1 %v1270_v17  ;;  %v1297_v50 = vld [vmem:[%s1697_s8 + $0x118] sm:$0xff]   ;;  %v1299_v51 = vld [vmem:[%s1697_s8 + $0x160] sm:$0xff]   ;;  %v1303_v53 = vld [vmem:[%s1697_s8 + $0x168] sm:$0xff]   ;;  %p1331_p4 = pnand %p1330_p3, %p1324_p0 }
  0x16   :  { %1131 = vmatprep.subr.bf16.mxu1 %v1271_v18  ;;  %v1301_v52 = vld [vmem:[%s1697_s8 + $0x120] sm:$0xff]   ;;  %v1305_v54 = vld [vmem:[%s1697_s8 + $0x128] sm:$0xff]   ;;  %v1307_v55 = vld [vmem:[%s1697_s8 + $0x170] sm:$0xff]  }
  0x17   :  { %v1309_v56 = vld [vmem:[%s1697_s8 + $0x130] sm:$0xff]   ;;  %v1311_v57 = vld [vmem:[%s1697_s8 + $0x178] sm:$0xff]   ;;  %v1049_v62 = vld [vmem:[%s1694_s5] ss:$0 sm:$0xff] }
  0x18   :  { %v1313_v58 = vld [vmem:[%s1697_s8 + $0x138] sm:$0xff]   ;;  %v300_v59 = vld [vmem:[%s1690_s1 + $0x10] sm:$0xff]  ;;  %v299_v63 = vld [vmem:[%s1690_s1 + $0x8] sm:$0xff] }
  0x19   :  { %1132 = vmatpush3.bf16.msra.mxu1 %v1272_v19  ;;  %v1059_v60 = vcombine.high %v300_v59, %v300_v59  ;;  %v1058_v61 = vcombine.low %v300_v59, %v300_v59  ;;  %v1286_v5 = vld [vmem:[%s1697_s8 + $0x80] sm:$0xff]   ;;  %v1057_v6 = vcombine.high %v299_v63, %v299_v63  ;;  %v1288_v8 = vld [vmem:[%s1697_s8 + $0xc8] sm:$0xff]   ;;  %v1292_v10 = vld [vmem:[%s1697_s8 + $0xd0] sm:$0xff]  }
  0x1a   :  { %1133 = vmatprep.subr.bf16.mxu1 %v1273_v20  ;;  %v1290_v9 = vld [vmem:[%s1697_s8 + $0x88] sm:$0xff]   ;;  %v1294_v11 = vld [vmem:[%s1697_s8 + $0x90] sm:$0xff]   ;;  %v1296_v12 = vld [vmem:[%s1697_s8 + $0xd8] sm:$0xff]  }
  0x1b   :  { %v1298_v13 = vld [vmem:[%s1697_s8 + $0x98] sm:$0xff]   ;;  %v1300_v14 = vld [vmem:[%s1697_s8 + $0xe0] sm:$0xff]   ;;  %v1304_v16 = vld [vmem:[%s1697_s8 + $0xe8] sm:$0xff]  }
  0x1c   :  { %v1302_v15 = vld [vmem:[%s1697_s8 + $0xa0] sm:$0xff]   ;;  %v1306_v17 = vld [vmem:[%s1697_s8 + $0xa8] sm:$0xff]   ;;  %v1308_v18 = vld [vmem:[%s1697_s8 + $0xf0] sm:$0xff]  }
  0x1d   :  { %1134 = vmatpush3.bf16.msra.mxu1 %v1274_v21  ;;  %v1310_v19 = vld [vmem:[%s1697_s8 + $0xb0] sm:$0xff]   ;;  %v1312_v20 = vld [vmem:[%s1697_s8 + $0xf8] sm:$0xff]   ;;  %v1053_v37 = vld [vmem:[%s1698_s9] ss:$0 sm:$0xff] }
  0x1e   :  { %1135 = vmatprep.subr.bf16.mxu1 %v1275_v22  ;;  %v1314_v21 = vld [vmem:[%s1697_s8 + $0xb8] sm:$0xff]   ;;  %v1056_v22 = vcombine.low %v299_v63, %v299_v63 }
  0x21   :  { %1136 = vmatpush3.bf16.msra.mxu1 %v1276_v23 }
  0x22   :  { %1137 = vmatprep.subr.bf16.mxu1 %v1277_v24 }
  0x25   :  { %1138 = vmatpush3.bf16.msra.mxu1 %v1278_v25 }
  0x26   :  { %1139 = vmatprep.subr.bf16.mxu1 %v1279_v26 }
  0x29   :  { %1140 = vmatpush3.bf16.msra.mxu1 %v1280_v35 }
  0x2a   :  { %1169 = vmatprep.subr.bf16.mxu1 %v1283_v41 }
  0x2c   :  { %746 = vmatmul.mubr.bf16.vlgmr.msra.gmra.mrb[0].mxu1 %v1054_v42 }
  0x2d   :  { %1170 = vmatpush3.bf16.msra.mxu1 %v1285_v44  ;;  %825 = vmatprep.mubr.bf16.mxu1 %v1059_v60  ;;  %v1109_v60 = vld [vmem:[%s1700_s11 + $0x1] ss:$0 sm:$0xff] }
  0x2e   :  { %1171 = vmatprep.subr.bf16.mxu1 %v1287_v45 }
  0x31   :  { %1172 = vmatpush3.bf16.msra.mxu1 %v1289_v46 }
  0x32   :  { %1173 = vmatprep.subr.bf16.mxu1 %v1291_v47 }
  0x35   :  { %1174 = vmatpush3.bf16.msra.mxu1 %v1293_v48 }
  0x36   :  { %1175 = vmatprep.subr.bf16.mxu1 %v1295_v49 }
  0x39   :  { %1176 = vmatpush3.bf16.msra.mxu1 %v1297_v50 }
  0x3a   :  { %1177 = vmatprep.subr.bf16.mxu1 %v1299_v51  ;;  %v869_v51 = vld [vmem:[%s1699_s10] sm:$0xff] }
  0x3d   :  { %1178 = vmatpush3.bf16.msra.mxu1 %v1301_v52  ;;  %v870_v52 = vld [vmem:[%s1699_s10 + $0x8] sm:$0xff] }
  0x3e   :  { %1179 = vmatprep.subr.bf16.mxu1 %v1303_v53 }
  0x41   :  { %1180 = vmatpush3.bf16.msra.mxu1 %v1305_v54  ;;  %v1246_v54 = vpack.c.bf16 %v870_v52, %v869_v51 }
  0x42   :  { %1181 = vmatprep.subr.bf16.mxu1 %v1307_v55 }
  0x45   :  { %1182 = vmatpush3.bf16.msra.mxu1 %v1309_v56 }
  0x46   :  { %1183 = vmatprep.subr.bf16.mxu1 %v1311_v57 }
  0x49   :  { %1184 = vmatpush3.bf16.msra.mxu1 %v1313_v58  ;;  %v1108_v58 = vld [vmem:[%s1700_s11] ss:$0 sm:$0xff] }
  0x4c   :  { %826 = vmatmul.mubr.bf16.vlgmr.msra.gmra.mrb[4].mxu1 %v1058_v61 }
  0xda   :  { %v123_v30 = vpop.f32.mrb[0].mxu0 }
  0xdb   :  { %v124_v31 = vadd.f32 %v1047_v27, %v123_v30  ;;  %v1200_v32 = vpop.f32.mrb[1].mxu0 }
  0xdd   :  { %v127_v34 = vmax.f32 %v124_v31, 0.0 }
  0xdf   :  { %1210 = vmatmul.mubr.msk.f32.vlgmr.msra.gmra.mrb[2].mxu0 %vm139_vm2, %v127_v34 }
  0xe0   :  { %1241 = vmatpush3.bf16.msra.mxu0 %v1240_v33  ;;  %1220 = vmatprep.mubr.msk.f32.mxu0 %vm1348_vm0, %v1349_v4  ;;  %v1051_v33 = vld [vmem:[%s1696_s7] ss:$0 sm:$0xff]  ;;  %s1350_s7 = smov 92  }
  0xe1   :  { %1242 = vmatprep.subr.bf16.mxu0 %v1347_v2 }
  0xe4   :  { %1244 = vmatpush3.bf16.msra.mxu0 %v1243_v38 }
  0xe5   :  { %1147 = vmatprep.subr.bf16.mxu0 %v1284_v43 }
  0xff   :  { %v1141_v23 = vpop.f32.mrb[0].mxu1 }
 0x100   :  { %v1142_v24 = vpop.f32.mrb[1].mxu1 }
 0x101   :  { %v1143_v25 = vadd.f32 %v1142_v24, %v1141_v23  ;;  %v1144_v26 = vpop.f32.mrb[2].mxu1 }
 0x102   :  { %v1145_v27 = vpop.f32.mrb[3].mxu1 }
 0x103   :  { %v748_v40 = vadd.f32 %v1143_v25, %v1053_v37 }
 0x11f   :  { %v1185_v28 = vpop.f32.mrb[4].mxu1 }
 0x120   :  { %v1186_v29 = vpop.f32.mrb[5].mxu1 }
 0x121   :  { %v1187_v30 = vadd.f32 %v1186_v29, %v1185_v28  ;;  %v1188_v31 = vpop.f32.mrb[6].mxu1 }
 0x122   :  { %v1189_v32 = vpop.f32.mrb[7].mxu1 }
 0x1b2   :  { %v209_v0 = vpop.f32.mrb[2].mxu0 }
 0x1b3   :  { %v210_v1 = vadd.f32 %v1049_v62, %v209_v0  ;;  %v1211_v3 = vpop.f32.mrb[3].mxu0 }
 0x1b4   :  { %v1111_v3 = vld [vmem:[%s1700_s11 + $0x2] ss:$0 sm:$0xff]  ;;  %s1357_s11 = smov 123  }
 0x1b5   :  { %v213_v7 = vmax.f32 %v210_v1, 0.0 }
 0x1b7   :  { %1221 = vmatmul.mubr.msk.f32.vlgmr.msra.gmra.mrb[4].mxu0 %vm139_vm2, %v213_v7 }
 0x1b8   :  { %1148 = vmatpush3.bf16.msra.mxu0 %v1286_v5  ;;  %785 = vmatprep.mubr.bf16.mxu0 %v1057_v6 }
 0x1b9   :  { %1149 = vmatprep.subr.bf16.mxu0 %v1288_v8 }
 0x1bc   :  { %1150 = vmatpush3.bf16.msra.mxu0 %v1290_v9 }
 0x1bd   :  { %1151 = vmatprep.subr.bf16.mxu0 %v1292_v10 }
 0x1c0   :  { %1152 = vmatpush3.bf16.msra.mxu0 %v1294_v11  ;;  %v1354_v11 = vmov 9  }
 0x1c1   :  { %1153 = vmatprep.subr.bf16.mxu0 %v1296_v12  ;;  %1262 = vset.pattern.permute.xlu1 %v1354_v11  ;;  %v1355_v12 = vmov 4  }
 0x1c2   :  { %1264 = vset.pattern.permute.xlu0 %v1355_v12 }
 0x1c4   :  { %1154 = vmatpush3.bf16.msra.mxu0 %v1298_v13 }
 0x1c5   :  { %1155 = vmatprep.subr.bf16.mxu0 %v1300_v14 }
 0x1c8   :  { %1156 = vmatpush3.bf16.msra.mxu0 %v1302_v15 }
 0x1c9   :  { %1157 = vmatprep.subr.bf16.mxu0 %v1304_v16 }
 0x1cc   :  { %1158 = vmatpush3.bf16.msra.mxu0 %v1306_v17 }
 0x1cd   :  { %1159 = vmatprep.subr.bf16.mxu0 %v1308_v18 }
 0x1d0   :  { %1160 = vmatpush3.bf16.msra.mxu0 %v1310_v19 }
 0x1d1   :  { %1161 = vmatprep.subr.bf16.mxu0 %v1312_v20 }
 0x1d4   :  { %1162 = vmatpush3.bf16.msra.mxu0 %v1314_v21 }
 0x1d5   :  { %1245 = vmatprep.subr.bf16.mxu0 %v1347_v2 }
 0x1d7   :  { %786 = vmatmul.mubr.bf16.vlgmr.msra.gmra.mrb[8].mxu0 %v1056_v22 }
 0x1d8   :  { %1227 = vmatprep.mubr.msk.f32.mxu0 %vm1348_vm0, %v1349_v4  ;;  %1247 = vmatpush3.bf16.msra.mxu0 %v1246_v54 }
 0x28a   :  { %v294_v34 = vpop.f32.mrb[4].mxu0 }
 0x28b   :  { %v1638_v2 = vadd.f32 %v1051_v33, %v294_v34  ;;  %v1222_v35 = vpop.f32.mrb[5].mxu0 }
 0x28d   :  { %v833_v4 = vmul.f32 %v1638_v2, %v1638_v2 }
 0x28f   :  { %v834_v36 = vsel %vm139_vm2, %v833_v4, 0.0 }
 0x290   :  { %835 = vadd.xlane.f32.xlu0 %v834_v36 }
 0x2aa   :  { %v1163_v38 = vpop.f32.mrb[8].mxu0 }
 0x2ab   :  { %v1164_v39 = vpop.f32.mrb[9].mxu0 }
 0x2ac   :  { %v1165_v41 = vadd.f32 %v1164_v39, %v1163_v38  ;;  %v1166_v42 = vpop.f32.mrb[10].mxu0 }
 0x2ad   :  { %v1167_v43 = vpop.f32.mrb[11].mxu0 }
 0x2ae   :  { %v788_v44 = vadd.f32 %v1165_v41, %v748_v40 }
 0x2b0   :  { %v1646_v45 = vadd.f32 %v1187_v30, %v788_v44 }
 0x2b2   :  { %v837_v46 = vmul.f32 %v1646_v45, %v1646_v45 }
 0x2b4   :  { %v838_v47 = vsel %vm139_vm2, %v837_v46, 0.0 }
 0x2b5   :  { %839 = vadd.xlane.f32.xlu0 %v838_v47 }
 0x31d   :  { %v836_v48 = vpop.xlane.xlu0 %835 }
 0x31e   :  { %v841_v49 = vadd.f32 %v836_v48, %v1638_v2 }
 0x320   :  { %v842_v50 = vmax.f32 %v841_v49, 0.0 }
 0x322   :  { %846 = vrot.lane.b32.xlu1 %v842_v50, %s1350_s7 }
 0x342   :  { %v840_v53 = vpop.xlane.xlu0 %839 }
 0x343   :  { %v843_v55 = vadd.f32 %v840_v53, %v1646_v45 }
 0x345   :  { %v844_v56 = vmax.f32 %v843_v55, 0.0 }
 0x347   :  { %850 = vrot.lane.b32.xlu1 %v844_v56, %s1351_s19 }
 0x394   :  { %v847_v57 = vpop.permute.xlu1 %846 }
 0x3b9   :  { %v851_v59 = vpop.permute.xlu1 %850 }
 0x3ba   :  { %v854_v61 = vsel %vm853_vm3, %v847_v57, %v851_v59 }
 0x3bb   :  { %v861_v62 = vmul.f32 %v1108_v58, %v854_v61 }
 0x3bd   :  { %v866_v63 = vsub.f32 %v1109_v60, %v861_v62 }
 0x3bf   :  { %v867_v0 = vmul.f32 1.442695, %v866_v63 }
 0x3c1   :  { %1319 = vpow2.f32 %v867_v0 }
 0x3cb   :  { %v1320_v1 = vpop.eup %1319 }
 0x3cc   :  { %1228 = vmatmul.mubr.msk.f32.vlgmr.msra.gmra.mrb[6].mxu0 %vm53_vm1, %v1320_v1 }
 0x49f   :  { %v940_v5 = vpop.f32.mrb[6].mxu0 }
 0x4a0   :  { %v949_v6 = vmul.f32 %v1111_v3, %v940_v5  ;;  %v1229_v7 = vpop.f32.mrb[7].mxu0 }
 0x4a2   :  { %v950_v8 = vadd.f32 1.0, %v949_v6 }
 0x4a4   :  { %952 = vrot.lane.b32.xlu0 %v950_v8, %s1352_s23 }
 0x516   :  { %v953_v9 = vpop.permute.xlu0 %952 }
 0x517   :  { %v955_v10 = vmul.f32 %v953_v9, %v950_v8 }
 0x519   :  { %957 = vrot.lane.b32.xlu1 %v955_v10, %s1353_s24 }
 0x58b   :  { %v958_v13 = vpop.permute.xlu1 %957 }
 0x58c   :  { %v960_v14 = vmul.f32 %v958_v13, %v955_v10 }
 0x58e   :  { %962 = vrot.lane.b32.xlu1 %v960_v14, %s1356_s25 }
 0x600   :  { %v963_v15 = vpop.permute.xlu1 %962 }
 0x601   :  { %v965_v16 = vmul.f32 %v963_v15, %v960_v14 }
 0x603   :  { %973 = vperm.xlu1 %1262, %v965_v16  }
 0x607   :  { %1263 = vset.pattern.permute.xlu1 %v1355_v12 }
 0x608   :  { %968 = vperm.xlu1 %1263, %v965_v16  }
 0x682   :  { %v974_v17 = vpop.permute.xlu1 %973 }
 0x683   :  { %v976_v18 = vsub.f32 %v965_v16, %v974_v17 }
 0x685   :  { %v977_v19 = vadd.f32 %v976_v18, %v974_v17 }
 0x687   :  { %979 = vrot.lane.b32.xlu1 %v977_v19, %s1357_s11  ;;  %v969_v20 = vpop.permute.xlu1 %968 }
 0x688   :  { %v983_v21 = vmul.f32 %v976_v18, %v969_v20  ;;  %v971_v23 = vsub.f32 %v965_v16, %v969_v20 }
 0x68b   :  { %985 = vrot.lane.b32.xlu1 %v983_v21, %s1357_s11 }
 0x68f   :  { %989 = vrot.lane.b32.xlu1 %v965_v16, %s1357_s11 }
 0x6f9   :  { %v980_v22 = vpop.permute.xlu1 %979 }
 0x6fa   :  { %v982_v24 = vmul.f32 %v980_v22, %v971_v23 }
 0x6fd   :  { %v986_v25 = vpop.permute.xlu1 %985 }
 0x6fe   :  { %v988_v26 = vadd.f32 %v986_v25, %v982_v24 }
 0x700   :  { %v994_v27 = vsel %vm993_vm4, %v988_v26, 0.0 }
 0x701   :  { %995 = vadd.xlane.f32.xlu0 %v994_v27  ;;  %v990_v28 = vpop.permute.xlu1 %989 }
 0x702   :  { %v992_v29 = vmul.f32 %v990_v28, %v965_v16 }
 0x704   :  { %v1000_v30 = vmul.f32 0.25, %v992_v29 }
 0x706   :  { %1003 = vperm.xlu1 %1263, %v1000_v30  }
 0x785   :  { %v1004_v4 = vpop.permute.xlu1 %1003 }
 0x786   :  { %v1006_v38 = vadd.f32 %v1004_v4, %v988_v26 }
 0x78e   :  { %v996_v31 = vpop.xlane.xlu0 %995 }
 0x78f   :  { %v997_v32 = vadd.f32 %v996_v31, %v992_v29 }
 0x791   :  { %v998_v33 = vadd.f32 1e-30, %v997_v32 }
 0x793   :  { %1321 = vrcp.f32 %v998_v33 }
 0x79d   :  { %v1322_v34 = vpop.eup %1321 }
 0x79e   :  { %1009 = vperm.xlu1 %1263, %v1322_v34   ;;  %v1013_v35 = vmul.f32 %v1322_v34, %v992_v29 }
 0x7a2   :  { %1015 = vrot.lane.b32.xlu1 %v1638_v2, %s1351_s19 }
 0x7a6   :  { %1019 = vrot.lane.b32.xlu1 %v1646_v45, %s1358_s26 }
 0x7aa   :  { %1023 = vrot.lane.b32.xlu1 %v1013_v35, %s1359_s27 }
 0x81d   :  { %v1010_v36 = vpop.permute.xlu1 %1009 }
 0x81e   :  { %v1012_v40 = vmul.f32 %v1010_v36, %v1006_v38 }
 0x821   :  { %v1016_v37 = vpop.permute.xlu1 %1015 }
 0x822   :  { %v1026_v41 = vsel %vm993_vm4, %v1012_v40, %v1016_v37 }
 0x825   :  { %v1020_v39 = vpop.permute.xlu1 %1019 }
 0x826   :  { %v1027_v2 = vsel %vm853_vm3, %v1026_v41, %v1020_v39 }
 0x829   :  { %v1024_v42 = vpop.permute.xlu1 %1023 }
 0x82a   :  { %v1029_v43 = vsel %vm1028_vm5, %v1027_v2, %v1024_v42 }
 0x82b   :  { %v1031_v44 = vsel %vm1030_vm6, %v1029_v43, 0.0 }
 0x82c   :  { %1032 = vst [vmem:[#allocation2] sm:$0xff] %v1031_v44 }
 0x82d   :  { %1334 = shalt.err (!%p1331_p4)
}
 0x82e   :  { %s1335_s30 = scalar_lea.hbm %s1701_s12, 128 }
 0x82f   :  { %p1336_p5 = scmp.ne.s32.totalorder %s1701_s12, %s1335_s30  ;;  %p1339_p6 = scmp.lt.u32.totalorder %s1335_s30, %s1701_s12 }
 0x831   :  { %p1341_p7 = pnand %p1339_p6, %p1336_p5 }
 0x833   :  { %1344 = shalt.err (!%p1341_p7)
}
 0x834   :  { %1042 = dma.vmem_to_hbm [thread:$0]  %s1040_s3, 128, %s1701_s12, [#allocation3]  }
 0x835   :  { %1345 = dma.done.wait [#allocation3], 128  }
 0x836   :  { %1346 = vsyncadd [#allocation3], 4294967168 }
 0x837   :  { %1046 = vsyncpa [#allocation3], 1 }

</bundles_post_ra>
